<compile_context>
chip_gen: v7x
topology: tpu7x:2x2x1
jax: 0.10.0
libtpu: 0.0.40
codegen_flags: <defaults>
</compile_context>

<pallas_src>
import math
import functools

import numpy as np
import jax
import jax.numpy as jnp
from jax import lax
from jax.experimental import pallas as pl
from jax.experimental.pallas import tpu as pltpu

# bf16 matmul operands (f32 accumulate) per v6e/v7x feedback; flip to jnp.float32 for strict parity.
MM_DTYPE = jnp.bfloat16
VMEM_LIMIT = 32 * 1024 * 1024   # stays well inside v7x's 64 MiB physical VMEM


# ----------------------------------------------------------------------------- small helpers

def _full(shape):
    # full-array block for a grid=(1,) pallas_call
    return pl.BlockSpec(shape, lambda i: (0,) * len(shape))


_SQRT_HALF = 0.7071067811865476


def _erf(z):
    # Abramowitz & Stegun 7.1.26 (|err| < 1.5e-7): exact-GELU erf built from elementwise ops
    # only (no reliance on an erf primitive lowering inside Mosaic).
    a1, a2, a3, a4, a5 = 0.254829592, -0.284496736, 1.421413741, -1.453152027, 1.061405429
    p = 0.3275911
    s = jnp.where(z < 0.0, -1.0, 1.0)
    az = jnp.abs(z)
    t = 1.0 / (1.0 + p * az)
    poly = ((((a5 * t + a4) * t + a3) * t + a2) * t + a1) * t
    return s * (1.0 - poly * jnp.exp(-az * az))


def _gelu_exact(x):
    return 0.5 * x * (1.0 + _erf(x * _SQRT_HALF))


def _layernorm(x, g, b):
    mu = jnp.mean(x, axis=-1, keepdims=True)
    var = jnp.mean(jnp.square(x - mu), axis=-1, keepdims=True)   # biased, like torch LN
    return (x - mu) * lax.rsqrt(var + 1e-5) * g + b


# ----------------------------------------------------------------------------- fused attention block

def _attn_block_kernel(x_ref, g_ref, b_ref, wqkv_ref, bqkv_ref, pbd_ref, edm_ref,
                       hmask_ref, maskmd_ref, wo_ref, bo_ref, o_ref,
                       *, heads, dim_head, nb_features, seq_len, batch):
    d = heads * dim_head
    mf = nb_features
    n = seq_len

    x = x_ref[...]                                          # (B*N, D) f32 residual stream
    h = _layernorm(x, g_ref[...], b_ref[...])               # f32

    # fused QKV projection (bf16 operands, f32 accumulation)
    qkv = jnp.dot(h.astype(MM_DTYPE), wqkv_ref[...],
                  preferred_element_type=jnp.float32) + bqkv_ref[...]     # (B*N, 3D)
    q = qkv[:, 0 * d:1 * d]
    k = qkv[:, 1 * d:2 * d]
    v = qkv[:, 2 * d:3 * d]

    # FAVOR+ softmax-kernel feature map; heads packed along lanes, shared proj as ONE 2D matmul
    dn = dim_head ** -0.25
    ratio = mf ** -0.5
    eps = 1e-4
    pbd = pbd_ref[...]                                      # (D, H*Mf) block-diag proj.T
    edm = edm_ref[...]                                      # (D, H*Mf) head-block indicator
    qd = jnp.dot(q * dn, pbd, preferred_element_type=jnp.float32)         # (B*N, H*Mf)
    kd = jnp.dot(k * dn, pbd, preferred_element_type=jnp.float32)
    half_dn2 = 0.5 * dn * dn
    q_diag = jnp.dot(q * q, edm, preferred_element_type=jnp.float32) * half_dn2
    k_diag = jnp.dot(k * k, edm, preferred_element_type=jnp.float32) * half_dn2

    # queries: per-(row, head) max; keys: single global max (matches torch.max(data_dash))
    hmask = hmask_ref[...]                                  # (H, H*Mf) lane indicator per head
    qmax = jnp.zeros_like(qd)
    for hh in range(heads):
        m_h = jnp.max(qd[:, hh * mf:(hh + 1) * mf], axis=-1, keepdims=True)
        qmax = qmax + m_h * hmask[hh:hh + 1, :]
    q_prime = ratio * (jnp.exp(qd - q_diag - qmax) + eps)
    k_prime = ratio * (jnp.exp(kd - k_diag - jnp.max(kd)) + eps)

    # non-causal linear attention + output projection + residual, per batch element
    maskmd = maskmd_ref[...]                                # (H*Mf, D) head-block indicator
    wo = wo_ref[...]
    bo = bo_ref[...]
    for bb in range(batch):
        r0 = bb * n
        qp = q_prime[r0:r0 + n, :]                          # (N, H*Mf)
        kp = k_prime[r0:r0 + n, :]
        vb = v[r0:r0 + n, :]                                # (N, D)
        # context = k'^T v : contract the sequence axis directly (no explicit transpose)
        ctx = lax.dot_general(kp, vb, (((0,), (0,)), ((), ())),
                              preferred_element_type=jnp.float32)          # (H*Mf, D)
        ctx = ctx * maskmd                                  # keep only same-head blocks
        out_b = jnp.dot(qp, ctx, preferred_element_type=jnp.float32)       # (N, D)
        ksum = jnp.sum(kp, axis=0, keepdims=True)                          # (1, H*Mf)
        denom = jnp.dot(qp * ksum, maskmd, preferred_element_type=jnp.float32)  # (N, D)
        attn = out_b * pl.reciprocal(denom, approx=True)
        proj_o = jnp.dot(attn.astype(MM_DTYPE), wo,
                         preferred_element_type=jnp.float32) + bo
        o_ref[pl.ds(r0, n), :] = x[r0:r0 + n, :] + proj_o


def attention_block(x2d, layer, e_dm, hmask, mask_md, *, heads, dim_head, nb_features,
                    seq_len, batch):
    m, d = x2d.shape
    hm = heads * nb_features
    kern = functools.partial(_attn_block_kernel, heads=heads, dim_head=dim_head,
                             nb_features=nb_features, seq_len=seq_len, batch=batch)
    flops = (2 * m * d * 3 * d + 4 * 2 * m * d * hm
             + batch * 3 * 2 * seq_len * hm * d + 2 * m * d * d)
    bytes_accessed = (2 * 4 * m * d + 2 * (3 * d * d + d * d)
                      + 4 * (2 * d * hm + heads * hm + hm * d) + 4 * 7 * d)
    return pl.pallas_call(
        kern,
        grid=(1,),
        in_specs=[_full((m, d)), _full((1, d)), _full((1, d)),
                  _full((d, 3 * d)), _full((1, 3 * d)),
                  _full((d, hm)), _full((d, hm)), _full((heads, hm)), _full((hm, d)),
                  _full((d, d)), _full((1, d))],
        out_specs=_full((m, d)),
        out_shape=jax.ShapeDtypeStruct((m, d), jnp.float32),
        compiler_params=pltpu.CompilerParams(
            dimension_semantics=("arbitrary",),
            vmem_limit_bytes=VMEM_LIMIT),
        cost_estimate=pl.CostEstimate(flops=flops, transcendentals=2 * m * hm,
                                      bytes_accessed=bytes_accessed),
    )(x2d, layer['ln1_g'], layer['ln1_b'], layer['wqkv'], layer['bqkv'],
      layer['p_bd'], e_dm, hmask, mask_md, layer['wo'], layer['bo'])


# ----------------------------------------------------------------------------- fused Chunk(FeedForward) block

def _ffn_kernel(x_ref, g_ref, b_ref, w1_ref, b1_ref, w2_ref, b2_ref, o_ref):
    # Chunk(chunks, FeedForward, along_dim=1): each grid step handles one sequence chunk.
    x = x_ref[...]                                          # (row_tile, D) f32
    h = _layernorm(x, g_ref[...], b_ref[...])
    h1 = jnp.dot(h.astype(MM_DTYPE), w1_ref[...],
                 preferred_element_type=jnp.float32) + b1_ref[...]
    h1 = _gelu_exact(h1)                                    # exact GELU (nn.GELU default)
    h2 = jnp.dot(h1.astype(MM_DTYPE), w2_ref[...],
                 preferred_element_type=jnp.float32) + b2_ref[...]
    o_ref[...] = x + h2


def ffn_block(x2d, layer, *, row_tile):
    m, d = x2d.shape
    dff = layer['w1'].shape[1]
    assert m % row_tile == 0 and row_tile % 8 == 0
    n_chunks = m // row_tile
    flops = 2 * 2 * m * d * dff
    bytes_accessed = 2 * 4 * m * d + 2 * 2 * d * dff + 4 * (dff + 3 * d)
    return pl.pallas_call(
        _ffn_kernel,
        grid=(n_chunks,),
        in_specs=[pl.BlockSpec((row_tile, d), lambda i: (i, 0)),
                  pl.BlockSpec((1, d), lambda i: (0, 0)),
                  pl.BlockSpec((1, d), lambda i: (0, 0)),
                  pl.BlockSpec((d, dff), lambda i: (0, 0)),
                  pl.BlockSpec((1, dff), lambda i: (0, 0)),
                  pl.BlockSpec((dff, d), lambda i: (0, 0)),
                  pl.BlockSpec((1, d), lambda i: (0, 0))],
        out_specs=pl.BlockSpec((row_tile, d), lambda i: (i, 0)),
        out_shape=jax.ShapeDtypeStruct((m, d), jnp.float32),
        compiler_params=pltpu.CompilerParams(
            dimension_semantics=("parallel",),      # shards chunks across TCs on v7x
            vmem_limit_bytes=VMEM_LIMIT),
        cost_estimate=pl.CostEstimate(flops=flops, transcendentals=m * dff,
                                      bytes_accessed=bytes_accessed),
    )(x2d, layer['ln2_g'], layer['ln2_b'], layer['w1'], layer['b1'],
      layer['w2'], layer['b2'])


# ----------------------------------------------------------------------------- final LN + tied logits

def _final_kernel(x_ref, g_ref, b_ref, embt_ref, o_ref):
    h = _layernorm(x_ref[...], g_ref[...], b_ref[...])
    o_ref[...] = jnp.dot(h.astype(MM_DTYPE), embt_ref[...],
                         preferred_element_type=jnp.float32)


def final_logits(x2d, g, b, emb_t):
    m, d = x2d.shape
    vocab = emb_t.shape[1]
    return pl.pallas_call(
        _final_kernel,
        grid=(1,),
        in_specs=[_full((m, d)), _full((1, d)), _full((1, d)), _full((d, vocab))],
        out_specs=_full((m, vocab)),
        out_shape=jax.ShapeDtypeStruct((m, vocab), jnp.float32),
        compiler_params=pltpu.CompilerParams(
            dimension_semantics=("arbitrary",),
            vmem_limit_bytes=VMEM_LIMIT),
        cost_estimate=pl.CostEstimate(flops=2 * m * d * vocab, transcendentals=0,
                                      bytes_accessed=4 * m * (d + vocab) + 2 * d * vocab),
    )(x2d, g, b, emb_t)


# ----------------------------------------------------------------------------- params

def gaussian_orthogonal_random_matrix(nb_rows, nb_cols, seed=0):
    # deterministic host-side construction (scaling=0), mirrors the torch buffer init
    rng = np.random.default_rng(seed)
    nb_full_blocks = nb_rows // nb_cols
    blocks = []
    for _ in range(nb_full_blocks):
        qm, _ = np.linalg.qr(rng.standard_normal((nb_cols, nb_cols)))
        blocks.append(qm.T)
    rem = nb_rows - nb_full_blocks * nb_cols
    if rem > 0:
        qm, _ = np.linalg.qr(rng.standard_normal((nb_cols, nb_cols)))
        blocks.append(qm.T[:rem])
    final = np.concatenate(blocks, axis=0)
    multiplier = np.linalg.norm(rng.standard_normal((nb_rows, nb_cols)), axis=1)
    return (np.diag(multiplier) @ final).astype(np.float32)


def init_params(key, *, num_tokens, max_seq_len, dim, depth, heads, nb_features, ff_mult):
    dim_head = dim // heads
    hm = heads * nb_features
    keys = jax.random.split(key, 2 + depth)

    # shared head-block constants (heads packed along lanes)
    e_dm = np.zeros((dim, hm), np.float32)       # (D, H*Mf) head indicator
    mask_md = np.zeros((hm, dim), np.float32)    # (H*Mf, D) head indicator
    hmask = np.zeros((heads, hm), np.float32)    # per-head lane indicator
    for h in range(heads):
        e_dm[h * dim_head:(h + 1) * dim_head, h * nb_features:(h + 1) * nb_features] = 1.0
        mask_md[h * nb_features:(h + 1) * nb_features, h * dim_head:(h + 1) * dim_head] = 1.0
        hmask[h, h * nb_features:(h + 1) * nb_features] = 1.0

    token_emb = 0.02 * jax.random.normal(keys[0], (num_tokens, dim), jnp.float32)
    params = {
        'token_emb': token_emb,
        'emb_t': token_emb.T.astype(MM_DTYPE),       # pre-transposed once (hoisted .T)
        'pos_emb': 0.02 * jax.random.normal(keys[1], (max_seq_len, dim), jnp.float32),
        'norm_g': jnp.ones((1, dim), jnp.float32),
        'norm_b': jnp.zeros((1, dim), jnp.float32),
        'e_dm': jnp.asarray(e_dm),
        'mask_md': jnp.asarray(mask_md),
        'hmask': jnp.asarray(hmask),
        'layers': [],
    }

    def lin(k, d_in, d_out):
        return 0.02 * jax.random.normal(k, (d_in, d_out), jnp.float32)

    for li in range(depth):
        lk = jax.random.split(keys[2 + li], 6)
        proj = gaussian_orthogonal_random_matrix(nb_features, dim_head, seed=100 + li)
        # block-diagonal shared projection: one (D, H*Mf) matmul applies proj.T to every head
        p_bd = np.zeros((dim, hm), np.float32)
        for h in range(heads):
            p_bd[h * dim_head:(h + 1) * dim_head,
                 h * nb_features:(h + 1) * nb_features] = proj.T
        wq, wk, wv = lin(lk[0], dim, dim), lin(lk[1], dim, dim), lin(lk[2], dim, dim)
        layer = dict(
            ln1_g=jnp.ones((1, dim), jnp.float32), ln1_b=jnp.zeros((1, dim), jnp.float32),
            wqkv=jnp.concatenate([wq, wk, wv], axis=1).astype(MM_DTYPE),
            bqkv=jnp.zeros((1, 3 * dim), jnp.float32),
            wo=lin(lk[3], dim, dim).astype(MM_DTYPE), bo=jnp.zeros((1, dim), jnp.float32),
            ln2_g=jnp.ones((1, dim), jnp.float32), ln2_b=jnp.zeros((1, dim), jnp.float32),
            w1=lin(lk[4], dim, dim * ff_mult).astype(MM_DTYPE),
            b1=jnp.zeros((1, dim * ff_mult), jnp.float32),
            w2=lin(lk[5], dim * ff_mult, dim).astype(MM_DTYPE),
            b2=jnp.zeros((1, dim), jnp.float32),
            p_bd=jnp.asarray(p_bd),
        )
        params['layers'].append(layer)
    return params


# ----------------------------------------------------------------------------- forward

def performer_lm_forward(tokens, params, *, heads, dim_head, nb_features, ff_chunks=2):
    b, n = tokens.shape
    dim = heads * dim_head
    # TODO(synk): token/pos embedding lookup is a data-dependent gather; kept as plain-JAX glue.
    x = (params['token_emb'][tokens] + params['pos_emb'][:n][None, :, :]).reshape(b * n, dim)

    row_tile = (b * n) // ff_chunks      # Chunk(ff_chunks, FeedForward, along_dim=1) -> grid tiles
    for layer in params['layers']:
        x = attention_block(x, layer, params['e_dm'], params['hmask'], params['mask_md'],
                            heads=heads, dim_head=dim_head, nb_features=nb_features,
                            seq_len=n, batch=b)
        x = ffn_block(x, layer, row_tile=row_tile)

    logits = final_logits(x, params['norm_g'], params['norm_b'], params['emb_t'])
    return logits.reshape(b, n, -1)


# ----------------------------------------------------------------------------- main

if __name__ == "__main__":
    B, N = 2, 8
    NUM_TOKENS, MAX_SEQ_LEN = 64, 16
    DIM, DEPTH, HEADS, FF_MULT = 32, 2, 4, 4
    DIM_HEAD = DIM // HEADS
    NB_FEATURES = int(DIM_HEAD * math.log(DIM_HEAD))   # PerformerLM default -> 16
    FF_CHUNKS = 2                                      # the Chunk(chunks=2, FeedForward) wrapper

    key = jax.random.PRNGKey(0)
    pkey, tkey = jax.random.split(key)
    params = init_params(pkey, num_tokens=NUM_TOKENS, max_seq_len=MAX_SEQ_LEN,
                         dim=DIM, depth=DEPTH, heads=HEADS,
                         nb_features=NB_FEATURES, ff_mult=FF_MULT)
    tokens = jax.random.randint(tkey, (B, N), 0, NUM_TOKENS, dtype=jnp.int32)

    logits = performer_lm_forward(tokens, params, heads=HEADS, dim_head=DIM_HEAD,
                                  nb_features=NB_FEATURES, ff_chunks=FF_CHUNKS)
    logits = jax.block_until_ready(logits)
    assert logits.shape == (B, N, NUM_TOKENS)
    assert bool(jnp.all(jnp.isfinite(logits)))
    print("KERNEL_OK")
</pallas_src>

<mosaic_0001>
module attributes {stable_mosaic.version = 11 : i64} {
  func.func @_attn_block_kernel(%arg0: i32, %arg1: memref<16x32xf32, #tpu.memory_space<vmem>>, %arg2: memref<1x32xf32, #tpu.memory_space<vmem>>, %arg3: memref<1x32xf32, #tpu.memory_space<vmem>>, %arg4: memref<32x96xbf16, #tpu.memory_space<vmem>>, %arg5: memref<1x96xf32, #tpu.memory_space<vmem>>, %arg6: memref<32x64xf32, #tpu.memory_space<vmem>>, %arg7: memref<32x64xf32, #tpu.memory_space<vmem>>, %arg8: memref<4x64xf32, #tpu.memory_space<vmem>>, %arg9: memref<64x32xf32, #tpu.memory_space<vmem>>, %arg10: memref<32x32xbf16, #tpu.memory_space<vmem>>, %arg11: memref<1x32xf32, #tpu.memory_space<vmem>>, %arg12: memref<16x32xf32, #tpu.memory_space<vmem>>) attributes {dimension_semantics = [#tpu.dimension_semantics<arbitrary>], iteration_bounds = array<i64: 1>, scalar_prefetch = 0 : i64, scratch_operands = 0 : i64, tpu.core_type = #tpu.core_type<tc>, window_params = [{pipeline_mode = #tpu.pipeline_mode<synchronous>, transform_indices = @transform_0, window_bounds = array<i64: 16, 32>}, {pipeline_mode = #tpu.pipeline_mode<synchronous>, transform_indices = @transform_1, window_bounds = array<i64: 1, 32>}, {pipeline_mode = #tpu.pipeline_mode<synchronous>, transform_indices = @transform_2, window_bounds = array<i64: 1, 32>}, {pipeline_mode = #tpu.pipeline_mode<synchronous>, transform_indices = @transform_3, window_bounds = array<i64: 32, 96>}, {pipeline_mode = #tpu.pipeline_mode<synchronous>, transform_indices = @transform_4, window_bounds = array<i64: 1, 96>}, {pipeline_mode = #tpu.pipeline_mode<synchronous>, transform_indices = @transform_5, window_bounds = array<i64: 32, 64>}, {pipeline_mode = #tpu.pipeline_mode<synchronous>, transform_indices = @transform_6, window_bounds = array<i64: 32, 64>}, {pipeline_mode = #tpu.pipeline_mode<synchronous>, transform_indices = @transform_7, window_bounds = array<i64: 4, 64>}, {pipeline_mode = #tpu.pipeline_mode<synchronous>, transform_indices = @transform_8, window_bounds = array<i64: 64, 32>}, {pipeline_mode = #tpu.pipeline_mode<synchronous>, transform_indices = @transform_9, window_bounds = array<i64: 32, 32>}, {pipeline_mode = #tpu.pipeline_mode<synchronous>, transform_indices = @transform_10, window_bounds = array<i64: 1, 32>}, {pipeline_mode = #tpu.pipeline_mode<synchronous>, transform_indices = @transform_11, window_bounds = array<i64: 16, 32>}]} {
    %c0 = arith.constant 0 : index
    %c0_0 = arith.constant 0 : index
    %0 = vector.load %arg1[%c0, %c0_0] : memref<16x32xf32, #tpu.memory_space<vmem>>, vector<16x32xf32>
    %c0_1 = arith.constant 0 : index
    %c0_2 = arith.constant 0 : index
    %1 = vector.load %arg2[%c0_1, %c0_2] : memref<1x32xf32, #tpu.memory_space<vmem>>, vector<1x32xf32>
    %c0_3 = arith.constant 0 : index
    %c0_4 = arith.constant 0 : index
    %2 = vector.load %arg3[%c0_3, %c0_4] : memref<1x32xf32, #tpu.memory_space<vmem>>, vector<1x32xf32>
    %cst = arith.constant dense<0.000000e+00> : vector<16xf32>
    %3 = vector.multi_reduction <add>, %0, %cst [1] : vector<16x32xf32> to vector<16xf32>
    %4 = vector.shape_cast %3 : vector<16xf32> to vector<16x1xf32>
    %cst_5 = arith.constant 3.200000e+01 : f32
    %5 = vector.broadcast %cst_5 : f32 to vector<16x1xf32>
    %6 = arith.divf %4, %5 : vector<16x1xf32>
    %7 = vector.broadcast %6 : vector<16x1xf32> to vector<16x32xf32>
    %8 = arith.subf %0, %7 : vector<16x32xf32>
    %9 = arith.mulf %8, %8 : vector<16x32xf32>
    %cst_6 = arith.constant dense<0.000000e+00> : vector<16xf32>
    %10 = vector.multi_reduction <add>, %9, %cst_6 [1] : vector<16x32xf32> to vector<16xf32>
    %11 = vector.shape_cast %10 : vector<16xf32> to vector<16x1xf32>
    %cst_7 = arith.constant 3.200000e+01 : f32
    %12 = vector.broadcast %cst_7 : f32 to vector<16x1xf32>
    %13 = arith.divf %11, %12 : vector<16x1xf32>
    %14 = vector.broadcast %6 : vector<16x1xf32> to vector<16x32xf32>
    %15 = arith.subf %0, %14 : vector<16x32xf32>
    %cst_8 = arith.constant 9.99999974E-6 : f32
    %16 = vector.broadcast %cst_8 : f32 to vector<16x1xf32>
    %17 = arith.addf %13, %16 : vector<16x1xf32>
    %18 = math.rsqrt %17 : vector<16x1xf32>
    %19 = vector.broadcast %18 : vector<16x1xf32> to vector<16x32xf32>
    %20 = arith.mulf %15, %19 : vector<16x32xf32>
    %21 = vector.broadcast %1 : vector<1x32xf32> to vector<16x32xf32>
    %22 = arith.mulf %20, %21 : vector<16x32xf32>
    %23 = vector.broadcast %2 : vector<1x32xf32> to vector<16x32xf32>
    %24 = arith.addf %22, %23 : vector<16x32xf32>
    %25 = arith.truncf %24 : vector<16x32xf32> to vector<16x32xbf16>
    %c0_9 = arith.constant 0 : index
    %c0_10 = arith.constant 0 : index
    %26 = vector.load %arg4[%c0_9, %c0_10] : memref<32x96xbf16, #tpu.memory_space<vmem>>, vector<32x96xbf16>
    %cst_11 = arith.constant dense<0.000000e+00> : vector<16x96xf32>
    %27 = tpu.matmul %25, %26, %cst_11 {dimension_numbers = #tpu.dot_dimension_numbers<[1], [0], [0], [1], [0, 0, 1, 1], [], []>} : vector<16x32xbf16>, vector<32x96xbf16>, vector<16x96xf32> -> vector<16x96xf32>
    %c0_12 = arith.constant 0 : index
    %c0_13 = arith.constant 0 : index
    %28 = vector.load %arg5[%c0_12, %c0_13] : memref<1x96xf32, #tpu.memory_space<vmem>>, vector<1x96xf32>
    %29 = vector.broadcast %28 : vector<1x96xf32> to vector<16x96xf32>
    %30 = arith.addf %27, %29 : vector<16x96xf32>
    %31 = vector.extract_strided_slice %30 {offsets = [0, 0], sizes = [16, 32], strides = [1, 1]} : vector<16x96xf32> to vector<16x32xf32>
    %32 = vector.extract_strided_slice %30 {offsets = [0, 32], sizes = [16, 32], strides = [1, 1]} : vector<16x96xf32> to vector<16x32xf32>
    %33 = vector.extract_strided_slice %30 {offsets = [0, 64], sizes = [16, 32], strides = [1, 1]} : vector<16x96xf32> to vector<16x32xf32>
    %c0_14 = arith.constant 0 : index
    %c0_15 = arith.constant 0 : index
    %34 = vector.load %arg6[%c0_14, %c0_15] : memref<32x64xf32, #tpu.memory_space<vmem>>, vector<32x64xf32>
    %c0_16 = arith.constant 0 : index
    %c0_17 = arith.constant 0 : index
    %35 = vector.load %arg7[%c0_16, %c0_17] : memref<32x64xf32, #tpu.memory_space<vmem>>, vector<32x64xf32>
    %cst_18 = arith.constant 0.594603539 : f32
    %36 = vector.broadcast %cst_18 : f32 to vector<16x32xf32>
    %37 = arith.mulf %31, %36 : vector<16x32xf32>
    %cst_19 = arith.constant dense<0.000000e+00> : vector<16x64xf32>
    %38 = tpu.matmul %37, %34, %cst_19 {dimension_numbers = #tpu.dot_dimension_numbers<[1], [0], [0], [1], [0, 0, 1, 1], [], []>} : vector<16x32xf32>, vector<32x64xf32>, vector<16x64xf32> -> vector<16x64xf32>
    %cst_20 = arith.constant 0.594603539 : f32
    %39 = vector.broadcast %cst_20 : f32 to vector<16x32xf32>
    %40 = arith.mulf %32, %39 : vector<16x32xf32>
    %cst_21 = arith.constant dense<0.000000e+00> : vector<16x64xf32>
    %41 = tpu.matmul %40, %34, %cst_21 {dimension_numbers = #tpu.dot_dimension_numbers<[1], [0], [0], [1], [0, 0, 1, 1], [], []>} : vector<16x32xf32>, vector<32x64xf32>, vector<16x64xf32> -> vector<16x64xf32>
    %42 = arith.mulf %31, %31 : vector<16x32xf32>
    %cst_22 = arith.constant dense<0.000000e+00> : vector<16x64xf32>
    %43 = tpu.matmul %42, %35, %cst_22 {dimension_numbers = #tpu.dot_dimension_numbers<[1], [0], [0], [1], [0, 0, 1, 1], [], []>} : vector<16x32xf32>, vector<32x64xf32>, vector<16x64xf32> -> vector<16x64xf32>
    %cst_23 = arith.constant 0.176776692 : f32
    %44 = vector.broadcast %cst_23 : f32 to vector<16x64xf32>
    %45 = arith.mulf %43, %44 : vector<16x64xf32>
    %46 = arith.mulf %32, %32 : vector<16x32xf32>
    %cst_24 = arith.constant dense<0.000000e+00> : vector<16x64xf32>
    %47 = tpu.matmul %46, %35, %cst_24 {dimension_numbers = #tpu.dot_dimension_numbers<[1], [0], [0], [1], [0, 0, 1, 1], [], []>} : vector<16x32xf32>, vector<32x64xf32>, vector<16x64xf32> -> vector<16x64xf32>
    %cst_25 = arith.constant 0.176776692 : f32
    %48 = vector.broadcast %cst_25 : f32 to vector<16x64xf32>
    %49 = arith.mulf %47, %48 : vector<16x64xf32>
    %c0_26 = arith.constant 0 : index
    %c0_27 = arith.constant 0 : index
    %50 = vector.load %arg8[%c0_26, %c0_27] : memref<4x64xf32, #tpu.memory_space<vmem>>, vector<4x64xf32>
    %cst_28 = arith.constant 0.000000e+00 : f32
    %51 = vector.broadcast %cst_28 : f32 to vector<16x64xf32>
    %52 = vector.extract_strided_slice %38 {offsets = [0, 0], sizes = [16, 16], strides = [1, 1]} : vector<16x64xf32> to vector<16x16xf32>
    %cst_29 = arith.constant dense<0xFF800000> : vector<16xf32>
    %53 = vector.multi_reduction <maximumf>, %52, %cst_29 [1] : vector<16x16xf32> to vector<16xf32>
    %54 = vector.shape_cast %53 : vector<16xf32> to vector<16x1xf32>
    %55 = vector.extract_strided_slice %50 {offsets = [0, 0], sizes = [1, 64], strides = [1, 1]} : vector<4x64xf32> to vector<1x64xf32>
    %56 = vector.broadcast %54 : vector<16x1xf32> to vector<16x64xf32>
    %57 = vector.broadcast %55 : vector<1x64xf32> to vector<16x64xf32>
    %58 = arith.mulf %56, %57 : vector<16x64xf32>
    %59 = arith.addf %51, %58 : vector<16x64xf32>
    %60 = vector.extract_strided_slice %38 {offsets = [0, 16], sizes = [16, 16], strides = [1, 1]} : vector<16x64xf32> to vector<16x16xf32>
    %cst_30 = arith.constant dense<0xFF800000> : vector<16xf32>
    %61 = vector.multi_reduction <maximumf>, %60, %cst_30 [1] : vector<16x16xf32> to vector<16xf32>
    %62 = vector.shape_cast %61 : vector<16xf32> to vector<16x1xf32>
    %63 = vector.extract_strided_slice %50 {offsets = [1, 0], sizes = [1, 64], strides = [1, 1]} : vector<4x64xf32> to vector<1x64xf32>
    %64 = vector.broadcast %62 : vector<16x1xf32> to vector<16x64xf32>
    %65 = vector.broadcast %63 : vector<1x64xf32> to vector<16x64xf32>
    %66 = arith.mulf %64, %65 : vector<16x64xf32>
    %67 = arith.addf %59, %66 : vector<16x64xf32>
    %68 = vector.extract_strided_slice %38 {offsets = [0, 32], sizes = [16, 16], strides = [1, 1]} : vector<16x64xf32> to vector<16x16xf32>
    %cst_31 = arith.constant dense<0xFF800000> : vector<16xf32>
    %69 = vector.multi_reduction <maximumf>, %68, %cst_31 [1] : vector<16x16xf32> to vector<16xf32>
    %70 = vector.shape_cast %69 : vector<16xf32> to vector<16x1xf32>
    %71 = vector.extract_strided_slice %50 {offsets = [2, 0], sizes = [1, 64], strides = [1, 1]} : vector<4x64xf32> to vector<1x64xf32>
    %72 = vector.broadcast %70 : vector<16x1xf32> to vector<16x64xf32>
    %73 = vector.broadcast %71 : vector<1x64xf32> to vector<16x64xf32>
    %74 = arith.mulf %72, %73 : vector<16x64xf32>
    %75 = arith.addf %67, %74 : vector<16x64xf32>
    %76 = vector.extract_strided_slice %38 {offsets = [0, 48], sizes = [16, 16], strides = [1, 1]} : vector<16x64xf32> to vector<16x16xf32>
    %cst_32 = arith.constant dense<0xFF800000> : vector<16xf32>
    %77 = vector.multi_reduction <maximumf>, %76, %cst_32 [1] : vector<16x16xf32> to vector<16xf32>
    %78 = vector.shape_cast %77 : vector<16xf32> to vector<16x1xf32>
    %79 = vector.extract_strided_slice %50 {offsets = [3, 0], sizes = [1, 64], strides = [1, 1]} : vector<4x64xf32> to vector<1x64xf32>
    %80 = vector.broadcast %78 : vector<16x1xf32> to vector<16x64xf32>
    %81 = vector.broadcast %79 : vector<1x64xf32> to vector<16x64xf32>
    %82 = arith.mulf %80, %81 : vector<16x64xf32>
    %83 = arith.addf %75, %82 : vector<16x64xf32>
    %84 = arith.subf %38, %45 : vector<16x64xf32>
    %85 = arith.subf %84, %83 : vector<16x64xf32>
    %86 = math.exp %85 : vector<16x64xf32>
    %cst_33 = arith.constant 9.99999974E-5 : f32
    %87 = vector.broadcast %cst_33 : f32 to vector<16x64xf32>
    %88 = arith.addf %86, %87 : vector<16x64xf32>
    %cst_34 = arith.constant 2.500000e-01 : f32
    %89 = vector.broadcast %cst_34 : f32 to vector<16x64xf32>
    %90 = arith.mulf %89, %88 : vector<16x64xf32>
    %91 = arith.subf %41, %49 : vector<16x64xf32>
    %92 = vector.shape_cast %41 : vector<16x64xf32> to vector<1x16x64xf32>
    %cst_35 = arith.constant dense<0xFF800000> : vector<1xf32>
    %93 = vector.multi_reduction <maximumf>, %92, %cst_35 [1, 2] : vector<1x16x64xf32> to vector<1xf32>
    %94 = vector.shape_cast %93 : vector<1xf32> to vector<1x1x1xf32>
    %95 = vector.extract %94[0, 0, 0] : f32 from vector<1x1x1xf32>
    %96 = vector.broadcast %95 : f32 to vector<16x64xf32>
    %97 = arith.subf %91, %96 : vector<16x64xf32>
    %98 = math.exp %97 : vector<16x64xf32>
    %cst_36 = arith.constant 9.99999974E-5 : f32
    %99 = vector.broadcast %cst_36 : f32 to vector<16x64xf32>
    %100 = arith.addf %98, %99 : vector<16x64xf32>
    %cst_37 = arith.constant 2.500000e-01 : f32
    %101 = vector.broadcast %cst_37 : f32 to vector<16x64xf32>
    %102 = arith.mulf %101, %100 : vector<16x64xf32>
    %c0_38 = arith.constant 0 : index
    %c0_39 = arith.constant 0 : index
    %103 = vector.load %arg9[%c0_38, %c0_39] : memref<64x32xf32, #tpu.memory_space<vmem>>, vector<64x32xf32>
    %c0_40 = arith.constant 0 : index
    %c0_41 = arith.constant 0 : index
    %104 = vector.load %arg10[%c0_40, %c0_41] : memref<32x32xbf16, #tpu.memory_space<vmem>>, vector<32x32xbf16>
    %c0_42 = arith.constant 0 : index
    %c0_43 = arith.constant 0 : index
    %105 = vector.load %arg11[%c0_42, %c0_43] : memref<1x32xf32, #tpu.memory_space<vmem>>, vector<1x32xf32>
    %106 = vector.extract_strided_slice %90 {offsets = [0, 0], sizes = [8, 64], strides = [1, 1]} : vector<16x64xf32> to vector<8x64xf32>
    %107 = vector.extract_strided_slice %102 {offsets = [0, 0], sizes = [8, 64], strides = [1, 1]} : vector<16x64xf32> to vector<8x64xf32>
    %108 = vector.extract_strided_slice %33 {offsets = [0, 0], sizes = [8, 32], strides = [1, 1]} : vector<16x32xf32> to vector<8x32xf32>
    %cst_44 = arith.constant dense<0.000000e+00> : vector<64x32xf32>
    %109 = tpu.matmul %107, %108, %cst_44 {dimension_numbers = #tpu.dot_dimension_numbers<[0], [0], [1], [1], [0, 1, 1, 1], [], []>} : vector<8x64xf32>, vector<8x32xf32>, vector<64x32xf32> -> vector<64x32xf32>
    %110 = arith.mulf %109, %103 : vector<64x32xf32>
    %cst_45 = arith.constant dense<0.000000e+00> : vector<8x32xf32>
    %111 = tpu.matmul %106, %110, %cst_45 {dimension_numbers = #tpu.dot_dimension_numbers<[1], [0], [0], [1], [0, 0, 1, 1], [], []>} : vector<8x64xf32>, vector<64x32xf32>, vector<8x32xf32> -> vector<8x32xf32>
    %cst_46 = arith.constant dense<0.000000e+00> : vector<64xf32>
    %112 = vector.multi_reduction <add>, %107, %cst_46 [0] : vector<8x64xf32> to vector<64xf32>
    %113 = vector.shape_cast %112 : vector<64xf32> to vector<1x64xf32>
    %114 = vector.broadcast %113 : vector<1x64xf32> to vector<8x64xf32>
    %115 = arith.mulf %106, %114 : vector<8x64xf32>
    %cst_47 = arith.constant dense<0.000000e+00> : vector<8x32xf32>
    %116 = tpu.matmul %115, %103, %cst_47 {dimension_numbers = #tpu.dot_dimension_numbers<[1], [0], [0], [1], [0, 0, 1, 1], [], []>} : vector<8x64xf32>, vector<64x32xf32>, vector<8x32xf32> -> vector<8x32xf32>
    %117 = tpu.reciprocal %116 {approx = true} : vector<8x32xf32> -> vector<8x32xf32>
    %118 = arith.mulf %111, %117 : vector<8x32xf32>
    %119 = arith.truncf %118 : vector<8x32xf32> to vector<8x32xbf16>
    %cst_48 = arith.constant dense<0.000000e+00> : vector<8x32xf32>
    %120 = tpu.matmul %119, %104, %cst_48 {dimension_numbers = #tpu.dot_dimension_numbers<[1], [0], [0], [1], [0, 0, 1, 1], [], []>} : vector<8x32xbf16>, vector<32x32xbf16>, vector<8x32xf32> -> vector<8x32xf32>
    %121 = vector.broadcast %105 : vector<1x32xf32> to vector<8x32xf32>
    %122 = arith.addf %120, %121 : vector<8x32xf32>
    %123 = vector.extract_strided_slice %0 {offsets = [0, 0], sizes = [8, 32], strides = [1, 1]} : vector<16x32xf32> to vector<8x32xf32>
    %124 = arith.addf %123, %122 : vector<8x32xf32>
    %c0_49 = arith.constant 0 : index
    %c0_50 = arith.constant 0 : index
    %125 = vector.load %arg12[%c0_49, %c0_50] : memref<16x32xf32, #tpu.memory_space<vmem>>, vector<8x32xf32>
    tpu.vector_store %arg12[%c0_49, %c0_50], %124 {strides = array<i32>} : memref<16x32xf32, #tpu.memory_space<vmem>>, vector<8x32xf32>,
    %126 = vector.extract_strided_slice %90 {offsets = [8, 0], sizes = [8, 64], strides = [1, 1]} : vector<16x64xf32> to vector<8x64xf32>
    %127 = vector.extract_strided_slice %102 {offsets = [8, 0], sizes = [8, 64], strides = [1, 1]} : vector<16x64xf32> to vector<8x64xf32>
    %128 = vector.extract_strided_slice %33 {offsets = [8, 0], sizes = [8, 32], strides = [1, 1]} : vector<16x32xf32> to vector<8x32xf32>
    %cst_51 = arith.constant dense<0.000000e+00> : vector<64x32xf32>
    %129 = tpu.matmul %127, %128, %cst_51 {dimension_numbers = #tpu.dot_dimension_numbers<[0], [0], [1], [1], [0, 1, 1, 1], [], []>} : vector<8x64xf32>, vector<8x32xf32>, vector<64x32xf32> -> vector<64x32xf32>
    %130 = arith.mulf %129, %103 : vector<64x32xf32>
    %cst_52 = arith.constant dense<0.000000e+00> : vector<8x32xf32>
    %131 = tpu.matmul %126, %130, %cst_52 {dimension_numbers = #tpu.dot_dimension_numbers<[1], [0], [0], [1], [0, 0, 1, 1], [], []>} : vector<8x64xf32>, vector<64x32xf32>, vector<8x32xf32> -> vector<8x32xf32>
    %cst_53 = arith.constant dense<0.000000e+00> : vector<64xf32>
    %132 = vector.multi_reduction <add>, %127, %cst_53 [0] : vector<8x64xf32> to vector<64xf32>
    %133 = vector.shape_cast %132 : vector<64xf32> to vector<1x64xf32>
    %134 = vector.broadcast %133 : vector<1x64xf32> to vector<8x64xf32>
    %135 = arith.mulf %126, %134 : vector<8x64xf32>
    %cst_54 = arith.constant dense<0.000000e+00> : vector<8x32xf32>
    %136 = tpu.matmul %135, %103, %cst_54 {dimension_numbers = #tpu.dot_dimension_numbers<[1], [0], [0], [1], [0, 0, 1, 1], [], []>} : vector<8x64xf32>, vector<64x32xf32>, vector<8x32xf32> -> vector<8x32xf32>
    %137 = tpu.reciprocal %136 {approx = true} : vector<8x32xf32> -> vector<8x32xf32>
    %138 = arith.mulf %131, %137 : vector<8x32xf32>
    %139 = arith.truncf %138 : vector<8x32xf32> to vector<8x32xbf16>
    %cst_55 = arith.constant dense<0.000000e+00> : vector<8x32xf32>
    %140 = tpu.matmul %139, %104, %cst_55 {dimension_numbers = #tpu.dot_dimension_numbers<[1], [0], [0], [1], [0, 0, 1, 1], [], []>} : vector<8x32xbf16>, vector<32x32xbf16>, vector<8x32xf32> -> vector<8x32xf32>
    %141 = vector.broadcast %105 : vector<1x32xf32> to vector<8x32xf32>
    %142 = arith.addf %140, %141 : vector<8x32xf32>
    %143 = vector.extract_strided_slice %0 {offsets = [8, 0], sizes = [8, 32], strides = [1, 1]} : vector<16x32xf32> to vector<8x32xf32>
    %144 = arith.addf %143, %142 : vector<8x32xf32>
    %c8 = arith.constant 8 : index
    %c0_56 = arith.constant 0 : index
    %145 = vector.load %arg12[%c8, %c0_56] : memref<16x32xf32, #tpu.memory_space<vmem>>, vector<8x32xf32>
    tpu.vector_store %arg12[%c8, %c0_56], %144 {strides = array<i32>} : memref<16x32xf32, #tpu.memory_space<vmem>>, vector<8x32xf32>,
    return
  }
  func.func @transform_0(%arg0: i32) -> (i32, i32) {
    %c0_i32 = arith.constant 0 : i32
    %c0_i32_0 = arith.constant 0 : i32
    %c0_i32_1 = arith.constant 0 : i32
    return %c0_i32, %c0_i32_0 : i32, i32
  }
  func.func @transform_1(%arg0: i32) -> (i32, i32) {
    %c0_i32 = arith.constant 0 : i32
    %c0_i32_0 = arith.constant 0 : i32
    %c0_i32_1 = arith.constant 0 : i32
    return %c0_i32, %c0_i32_0 : i32, i32
  }
  func.func @transform_2(%arg0: i32) -> (i32, i32) {
    %c0_i32 = arith.constant 0 : i32
    %c0_i32_0 = arith.constant 0 : i32
    %c0_i32_1 = arith.constant 0 : i32
    return %c0_i32, %c0_i32_0 : i32, i32
  }
  func.func @transform_3(%arg0: i32) -> (i32, i32) {
    %c0_i32 = arith.constant 0 : i32
    %c0_i32_0 = arith.constant 0 : i32
    %c0_i32_1 = arith.constant 0 : i32
    return %c0_i32, %c0_i32_0 : i32, i32
  }
  func.func @transform_4(%arg0: i32) -> (i32, i32) {
    %c0_i32 = arith.constant 0 : i32
    %c0_i32_0 = arith.constant 0 : i32
    %c0_i32_1 = arith.constant 0 : i32
    return %c0_i32, %c0_i32_0 : i32, i32
  }
  func.func @transform_5(%arg0: i32) -> (i32, i32) {
    %c0_i32 = arith.constant 0 : i32
    %c0_i32_0 = arith.constant 0 : i32
    %c0_i32_1 = arith.constant 0 : i32
    return %c0_i32, %c0_i32_0 : i32, i32
  }
  func.func @transform_6(%arg0: i32) -> (i32, i32) {
    %c0_i32 = arith.constant 0 : i32
    %c0_i32_0 = arith.constant 0 : i32
    %c0_i32_1 = arith.constant 0 : i32
    return %c0_i32, %c0_i32_0 : i32, i32
  }
  func.func @transform_7(%arg0: i32) -> (i32, i32) {
    %c0_i32 = arith.constant 0 : i32
    %c0_i32_0 = arith.constant 0 : i32
    %c0_i32_1 = arith.constant 0 : i32
    return %c0_i32, %c0_i32_0 : i32, i32
  }
  func.func @transform_8(%arg0: i32) -> (i32, i32) {
    %c0_i32 = arith.constant 0 : i32
    %c0_i32_0 = arith.constant 0 : i32
    %c0_i32_1 = arith.constant 0 : i32
    return %c0_i32, %c0_i32_0 : i32, i32
  }
  func.func @transform_9(%arg0: i32) -> (i32, i32) {
    %c0_i32 = arith.constant 0 : i32
    %c0_i32_0 = arith.constant 0 : i32
    %c0_i32_1 = arith.constant 0 : i32
    return %c0_i32, %c0_i32_0 : i32, i32
  }
  func.func @transform_10(%arg0: i32) -> (i32, i32) {
    %c0_i32 = arith.constant 0 : i32
    %c0_i32_0 = arith.constant 0 : i32
    %c0_i32_1 = arith.constant 0 : i32
    return %c0_i32, %c0_i32_0 : i32, i32
  }
  func.func @transform_11(%arg0: i32) -> (i32, i32) {
    %c0_i32 = arith.constant 0 : i32
    %c0_i32_0 = arith.constant 0 : i32
    %c0_i32_1 = arith.constant 0 : i32
    return %c0_i32, %c0_i32_0 : i32, i32
  }
}

</mosaic_0001>

<bundles_post_ra>
// kernel: tpu_custom_call.1
= control target key start
LH: loop header
LB: loop body
LE: loop exit
PB: predicated region body
PF: predicated region fallthrough
CT: control target
= control target key end

     0   :  { %16 = vsyncpa [#allocation3], 0  ;;  %s2273_s0 = inlined_call_operand.vmem [shape: f32[16,32], index: 0, kind: input, shape index: {}]   ;;  %s2274_s1 = inlined_call_operand.vmem [shape: f32[1,32], index: 1, kind: input, shape index: {}]   ;;  %s2275_s2 = inlined_call_operand.vmem [shape: f32[1,32], index: 2, kind: input, shape index: {}]   ;;  %s2276_s3 = inlined_call_operand.vmem [shape: bf16[32,96], index: 3, kind: input, shape index: {}]   ;;  %s2277_s4 = inlined_call_operand.hbm [shape: f32[1,96], index: 4, kind: input, shape index: {}]   ;;  %s2278_s5 = inlined_call_operand.vmem [shape: f32[32,64], index: 5, kind: input, shape index: {}]   ;;  %s2279_s6 = inlined_call_operand.vmem [shape: f32[32,64], index: 6, kind: input, shape index: {}]   ;;  %s2280_s7 = inlined_call_operand.vmem [shape: f32[4,64], index: 7, kind: input, shape index: {}]   ;;  %s2281_s8 = inlined_call_operand.vmem [shape: f32[64,32], index: 8, kind: input, shape index: {}]   ;;  %s2282_s9 = inlined_call_operand.vmem [shape: bf16[32,32], index: 9, kind: input, shape index: {}]   ;;  %s2283_s10 = inlined_call_operand.vmem [shape: f32[1,32], index: 10, kind: input, shape index: {}]   ;;  %s2284_s11 = inlined_call_operand.hbm [shape: f32[16,32], index: 11, kind: output, shape index: {}]  }
   0x1   :  { %17 = vsyncpa [#allocation4], 0  ;;  %s1867_s17 = smov [#allocation2]   ;;  %s1819_s21 = scalar_lea.hbm %s2277_s4, 16 }
   0x2   :  { %s32_s18 = sshll.u32 %s1867_s17, 4  ;;  %p1820_p0 = scmp.ne.s32.totalorder %s2277_s4, %s1819_s21  ;;  %s33_s18 = int_to_ptr.vmem [resolvable:$true] %s32_s18 }
   0x3   :  { %p1823_p1 = scmp.lt.u32.totalorder %s1819_s21, %s2277_s4 }
   0x5   :  { %p1825_p2 = pnand %p1823_p1, %p1820_p0 }
   0x7   :  { %1828 = shalt.err (!%p1825_p2)
}
   0x8   :  { %s1829_s26 = scalar_lea.vmem %s33_s18, 16  ;;  %s1833_s27 = scalar_lea.vmem %s33_s18, 32 }
   0x9   :  { %p1830_p3 = scmp.ne.s32.totalorder %s33_s18, %s1829_s26  ;;  %p1834_p4 = scmp.lt.s32.totalorder %s33_s18, %s33_s18 }
   0xa   :  { %p1835_p5 = scmp.lt.s32.totalorder %s1833_s27, %s1829_s26 }
   0xc   :  { %p1836_p6 = por %p1835_p5, %p1834_p4 }
   0xe   :  { %p1837_p7 = pnand %p1836_p6, %p1830_p3 }
  0x10   :  { %1840 = shalt.err (!%p1837_p7)
}
  0x11   :  { %35 = dma.hbm_to_vmem [thread:$0]  %s2277_s4, 16, %s33_s18, [#allocation3]  }
  0x12   :  { %1863 = dma.done.wait [#allocation3], 16  }
  0x13   :  { %1864 = vsyncadd [#allocation3], 4294967280  ;;  %vm56_vm0 = vcmask 261120   ;;  %v1951_v0 = vld [vmem:[%s2273_s0] sm:$0xff]  ;;  %v1956_v1 = vld [vmem:[%s2273_s0 + $0x8] sm:$0xff]  ;;  %v1868_v15 = vmov 0.0  }
  0x14   :  { %v57_v2 = vsel %vm56_vm0, %v1951_v0, 0.0  ;;  %v60_v3 = vsel %vm56_vm0, %v1956_v1, 0.0  ;;  %v1799_v14 = vld [vmem:[%s2276_s3] sm:$0xff]   ;;  %1536 = vmatprep.subr.bf16.mxu1 %v1868_v15  ;;  %v1800_v16 = vld [vmem:[%s2276_s3 + $0x8] sm:$0xff]   ;;  %vm1869_vm1 = vmmov 0   ;;  %v170_v37 = vld [vmem:[%s2278_s5 + $0x10] sm:$0xff] }
  0x15   :  { %58 = vadd.xlane.f32.xlu0 %v57_v2  ;;  %1537 = vmatpush3.bf16.msra.mxu1 %v1799_v14  ;;  %v168_v17 = vld [vmem:[%s2278_s5] sm:$0xff]  ;;  %v169_v18 = vld [vmem:[%s2278_s5 + $0x8] sm:$0xff]  ;;  %v171_v38 = vld [vmem:[%s2278_s5 + $0x18] sm:$0xff]  ;;  %s1870_s14 = smov 96   ;;  %vm513_vm2 = vcmask 130048   ;;  %vm528_vm3 = vcmask 261248  }
  0x16   :  { %1540 = vmatprep.mubr.msk.bf16.mxu1 %vm1869_vm1, %v1868_v15  ;;  %1538 = vmatprep.subr.bf16.mxu1 %v1868_v15  ;;  %v1708_v19 = vpack.c.bf16 %v169_v18, %v168_v17  ;;  %v1410_v28 = vld [vmem:[%s2274_s1] ss:$0 sm:$0xff]  ;;  %v1712_v39 = vpack.c.bf16 %v171_v38, %v170_v37  ;;  %v173_v41 = vld [vmem:[%s2279_s6 + $0x8] sm:$0xff]  ;;  %v174_v48 = vld [vmem:[%s2279_s6 + $0x10] sm:$0xff]  ;;  %vm587_vm4 = vcmask 523264   ;;  %vm543_vm5 = vcmask 392448  }
  0x17   :  { %v1411_v32 = vld [vmem:[%s2275_s2] ss:$0 sm:$0xff]  ;;  %v175_v49 = vld [vmem:[%s2279_s6 + $0x18] sm:$0xff]  ;;  %vm558_vm6 = vcmask 523648   ;;  %vm660_vm7 = vcmask 64512   ;;  %s1873_s12 = smov [#allocation5]  }
  0x18   :  { %1717 = vmatprep.subr.bf16.mxu0 %v1708_v19  ;;  %v172_v40 = vld [vmem:[%s2279_s6] sm:$0xff]  ;;  %v1728_v54 = vpack.c.bf16 %v175_v49, %v174_v48  ;;  %s1871_s6 = smov 64   ;;  %v2123_v37 = vld [vmem:[%s2281_s8 + $0x38] sm:$0xff]  ;;  %s1398_s13 = sshll.u32 %s1873_s12, 4  ;;  %s1399_s13 = int_to_ptr.vmem [resolvable:$true] %s1398_s13 }
  0x19   :  { %61 = vadd.xlane.f32.xlu0 %v60_v3  ;;  %1539 = vmatpush3.bf16.msra.mxu1 %v1800_v16  ;;  %v1724_v42 = vpack.c.bf16 %v173_v41, %v172_v40  ;;  %v1412_v43 = vld [vmem:[#allocation2] ss:$0 sm:$0xff]  ;;  %v520_v41 = vlaneseq  ;;  %p1846_p9 = scmp.lt.s32.totalorder %s1399_s13, %s1399_s13 }
  0x1a   :  { %1709 = vmatprep.subr.bf16.mxu1 %v1708_v19  ;;  %1719 = vmatpush3.bf16.msra.mxu0 %v1708_v19 }
  0x1b   :  { %1721 = vmatprep.subr.bf16.mxu0 %v1712_v39 }
  0x1e   :  { %1723 = vmatpush3.bf16.msra.mxu0 %v1712_v39 }
  0x1f   :  { %1733 = vmatprep.subr.bf16.mxu0 %v1724_v42 }
  0xa2   :  { %v59_v4 = vpop.xlane.xlu0 %58 }
  0xa3   :  { %v64_v5 = vmul.f32 0.03125, %v59_v4 }
  0xa5   :  { %v66_v6 = vsub.f32 %v1951_v0, %v64_v5 }
  0xa6   :  { %v62_v7 = vpop.xlane.xlu0 %61 }
  0xa7   :  { %v65_v8 = vmul.f32 0.03125, %v62_v7  ;;  %v68_v9 = vmul.f32 %v66_v6, %v66_v6 }
  0xa9   :  { %v67_v10 = vsub.f32 %v1956_v1, %v65_v8  ;;  %v70_v11 = vsel %vm56_vm0, %v68_v9, 0.0 }
  0xaa   :  { %71 = vadd.xlane.f32.xlu1 %v70_v11 }
  0xab   :  { %v69_v12 = vmul.f32 %v67_v10, %v67_v10 }
  0xad   :  { %v73_v13 = vsel %vm56_vm0, %v69_v12, 0.0 }
  0xae   :  { %74 = vadd.xlane.f32.xlu1 %v73_v13 }
 0x137   :  { %v72_v20 = vpop.xlane.xlu1 %71 }
 0x138   :  { %v76_v21 = vmul.f32 0.03125, %v72_v20 }
 0x13a   :  { %v78_v22 = vadd.f32 1e-05, %v76_v21 }
 0x13b   :  { %v75_v23 = vpop.xlane.xlu1 %74 }
 0x13c   :  { %1803 = vrsqrt.f32 %v78_v22  ;;  %v77_v24 = vmul.f32 0.03125, %v75_v23 }
 0x13e   :  { %v79_v25 = vadd.f32 1e-05, %v77_v24 }
 0x140   :  { %1805 = vrsqrt.f32 %v79_v25 }
 0x146   :  { %v1804_v26 = vpop.eup %1803 }
 0x147   :  { %v82_v27 = vmul.f32 %v1804_v26, %v66_v6  ;;  %v2068_v26 = vld [vmem:[%s2281_s8] sm:$0xff] }
 0x149   :  { %v90_v31 = vmul.f32 %v1410_v28, %v82_v27  ;;  %v2073_v27 = vld [vmem:[%s2281_s8 + $0x8] sm:$0xff] }
 0x14a   :  { %v1806_v29 = vpop.eup %1805 }
 0x14b   :  { %v83_v30 = vmul.f32 %v1806_v29, %v67_v10  ;;  %v98_v34 = vadd.f32 %v1411_v32, %v90_v31  ;;  %v2078_v29 = vpack.c.bf16 %v2073_v27, %v2068_v26  ;;  %v2091_v31 = vld [vmem:[%s2281_s8 + $0x18] sm:$0xff] }
 0x14d   :  { %v91_v33 = vmul.f32 %v1410_v28, %v83_v30  ;;  %v1872_v28 = vmov 0.0|0.0   ;;  %v2086_v30 = vld [vmem:[%s2281_s8 + $0x10] sm:$0xff] }
 0x14f   :  { %v99_v35 = vadd.f32 %v1411_v32, %v91_v33  ;;  %v2095_v32 = vpack.c.bf16 %v2091_v31, %v2086_v30  ;;  %v2102_v33 = vld [vmem:[%s2281_s8 + $0x20] sm:$0xff] }
 0x151   :  { %v100_v36 = vpack.c.bf16 %v99_v35, %v98_v34  ;;  %v2107_v34 = vld [vmem:[%s2281_s8 + $0x28] sm:$0xff] }
 0x152   :  { %v2111_v35 = vpack.c.bf16 %v2107_v34, %v2102_v33 }
 0x153   :  { %1541 = vmatmul.mubr.msk.bf16.vlgmr.msra.gmra.mrb[0].mxu1 %vm56_vm0, %v100_v36  ;;  %v2118_v36 = vld [vmem:[%s2281_s8 + $0x30] sm:$0xff] }
 0x154   :  { %1711 = vmatpush3.bf16.msra.mxu1 %v1708_v19  ;;  %v2127_v38 = vpack.c.bf16 %v2123_v37, %v2118_v36 }
 0x155   :  { %1713 = vmatprep.subr.bf16.mxu1 %v1712_v39 }
 0x158   :  { %1715 = vmatpush3.bf16.msra.mxu1 %v1712_v39 }
 0x159   :  { %1725 = vmatprep.subr.bf16.mxu1 %v1724_v42 }
 0x226   :  { %v161_v44 = vpop.f32.mrb[0].mxu1 }
 0x227   :  { %v162_v45 = vadd.f32 %v1412_v43, %v161_v44  ;;  %v1542_v46 = vpop.f32.mrb[1].mxu1  ;;  %v521_v44 = vshrl.u32 %v520_v41, 7 }
 0x228   :  { %v164_v47 = vpop.f32.mrb[2].mxu1 }
 0x229   :  { %v2007_v50 = vadd.f32 %v1412_v43, %v164_v47  ;;  %v1543_v51 = vpop.f32.mrb[3].mxu1  ;;  %v176_v52 = vmul.f32 0.59460354, %v162_v45  ;;  %v342_v55 = vmul.f32 %v162_v45, %v162_v45  ;;  %v537_v46 = vsub.s32 1, %v521_v44 }
 0x22a   :  { %v522_v49 = vsub.s32 0, %v521_v44  ;;  %v552_v51 = vsub.s32 2, %v521_v44 }
 0x22b   :  { %259 = vrot.lane.b32.xlu0 %v176_v52, %s1870_s14  ;;  %1552 = vmatprep.mubr.msk.f32.mxu1 %vm56_vm0, %v176_v52  ;;  %v177_v53 = vmul.f32 0.59460354, %v2007_v50  ;;  %v343_v56 = vmul.f32 %v2007_v50, %v2007_v50 }
 0x22d   :  { %261 = vrot.lane.b32.xlu1 %v177_v53, %s1870_s14  ;;  %1553 = vmatmul.mubr.msk.f32.vlgmr.msra.gmra.mrb[4].mxu1 %vm56_vm0, %v177_v53 }
 0x22e   :  { %1727 = vmatpush3.bf16.msra.mxu1 %v1724_v42  ;;  %1574 = vmatprep.mubr.msk.f32.mxu1 %vm56_vm0, %v342_v55 }
 0x22f   :  { %1729 = vmatprep.subr.bf16.mxu1 %v1728_v54 }
 0x231   :  { %427 = vrot.lane.b32.xlu1 %v342_v55, %s1870_s14 }
 0x232   :  { %1731 = vmatpush3.bf16.msra.mxu1 %v1728_v54 }
 0x235   :  { %1575 = vmatmul.mubr.msk.f32.vlgmr.msra.gmra.mrb[6].mxu1 %vm56_vm0, %v343_v56  ;;  %429 = vrot.lane.b32.xlu1 %v343_v56, %s1870_s14 }
 0x239   :  { %657 = vrot.lane.b32.xlu1 %v162_v45, %s1871_s6 }
 0x29d   :  { %v260_v57 = vpop.permute.xlu0 %259 }
 0x29e   :  { %1563 = vmatprep.mubr.msk.f32.mxu0 %vm56_vm0, %v260_v57 }
 0x29f   :  { %v262_v58 = vpop.permute.xlu1 %261 }
 0x2a0   :  { %1564 = vmatmul.mubr.msk.f32.vlgmr.msra.gmra.mrb[0].mxu0 %vm56_vm0, %v262_v58  ;;  %v567_v58 = vsub.s32 3, %v521_v44 }
 0x2a1   :  { %1735 = vmatpush3.bf16.msra.mxu0 %v1724_v42 }
 0x2a2   :  { %1737 = vmatprep.subr.bf16.mxu0 %v1728_v54 }
 0x2a3   :  { %v428_v59 = vpop.permute.xlu1 %427 }
 0x2a4   :  { %1585 = vmatprep.mubr.msk.f32.mxu0 %vm56_vm0, %v428_v59 }
 0x2a5   :  { %1739 = vmatpush3.bf16.msra.mxu0 %v1728_v54 }
 0x2a6   :  { %1752 = vmatprep.subr.bf16.mxu0 %v1872_v28 }
 0x2a7   :  { %v430_v60 = vpop.permute.xlu1 %429 }
 0x2a8   :  { %1586 = vmatmul.mubr.msk.f32.vlgmr.msra.gmra.mrb[2].mxu0 %vm56_vm0, %v430_v60 }
 0x2a9   :  { %1637 = vmatprep.mubr.msk.f32.mxu0 %vm1869_vm1, %v1868_v15  ;;  %1754 = vmatpush3.bf16.msra.mxu0 %v2078_v29 }
 0x2aa   :  { %1755 = vmatprep.subr.bf16.mxu0 %v1872_v28 }
 0x2ab   :  { %v658_v61 = vpop.permute.xlu1 %657 }
 0x2ac   :  { %1588 = vmatprep.subr.mxu1 %v658_v61 }
 0x2ad   :  { %1589 = vmatpush3.msra.mxu1 %v658_v61  ;;  %1757 = vmatpush3.bf16.msra.mxu0 %v2095_v32 }
 0x2ae   :  { %1740 = vmatprep.subr.bf16.mxu1 %v1872_v28  ;;  %1758 = vmatprep.subr.bf16.mxu0 %v1872_v28 }
 0x2b1   :  { %1760 = vmatpush3.bf16.msra.mxu0 %v2111_v35 }
 0x2b2   :  { %1761 = vmatprep.subr.bf16.mxu0 %v1872_v28 }
 0x2b5   :  { %1763 = vmatpush3.bf16.msra.mxu0 %v2127_v38 }
 0x300   :  { %v2023_v62 = vpop.f32.mrb[4].mxu1 }
 0x301   :  { %v2025_v63 = vpop.f32.mrb[5].mxu1  ;;  %v517_v2 = vsel %vm513_vm2, %v2023_v62, -inf  ;;  %v2031_v3 = vsel %vm528_vm3, %v2023_v62, -inf  ;;  %v547_v39 = vsel %vm543_vm5, %v2023_v62, -inf  ;;  %v562_v40 = vsel %vm558_vm6, %v2023_v62, -inf }
 0x302   :  { %v514_v17 = vsel %vm513_vm2, %v2025_v63, -inf  ;;  %v529_v23 = vsel %vm528_vm3, %v2025_v63, -inf  ;;  %v544_v24 = vsel %vm543_vm5, %v2025_v63, -inf  ;;  %v559_v25 = vsel %vm558_vm6, %v2025_v63, -inf }
 0x308   :  { %v1576_v4 = vpop.f32.mrb[6].mxu1 }
 0x309   :  { %v2033_v5 = vmul.f32 0.17677669, %v1576_v4  ;;  %v416_v6 = vpop.f32.mrb[7].mxu1 }
 0x30a   :  { %v2035_v7 = vmul.f32 0.17677669, %v416_v6 }
 0x30b   :  { %v574_v8 = vsub.f32 %v2023_v62, %v2033_v5 }
 0x30c   :  { %v573_v9 = vsub.f32 %v2025_v63, %v2035_v7 }
 0x373   :  { %v2041_v10 = vpop.f32.mrb[0].mxu0 }
 0x374   :  { %v589_v11 = vsel %vm587_vm4, %v2041_v10, -inf  ;;  %v2045_v12 = vpop.f32.mrb[1].mxu0 }
 0x375   :  { %v588_v13 = vsel %vm587_vm4, %v2045_v12, -inf }
 0x376   :  { %v590_v14 = vmax.f32 %v588_v13, %v589_v11 }
 0x378   :  { %591 = vmax.xlane.f32.xlu0 %v590_v14 }
 0x37b   :  { %v1587_v16 = vpop.f32.mrb[2].mxu0 }
 0x37c   :  { %v2051_v18 = vmul.f32 0.17677669, %v1587_v16  ;;  %v501_v19 = vpop.f32.mrb[3].mxu0  ;;  %515 = vmax.xlane.f32.xlu0 %v514_v17 }
 0x37d   :  { %v2053_v20 = vmul.f32 0.17677669, %v501_v19 }
 0x37e   :  { %v586_v21 = vsub.f32 %v2041_v10, %v2051_v18 }
 0x37f   :  { %v585_v22 = vsub.f32 %v2045_v12, %v2053_v20 }
 0x380   :  { %530 = vmax.xlane.f32.xlu0 %v529_v23 }
 0x384   :  { %545 = vmax.xlane.f32.xlu0 %v544_v24 }
 0x388   :  { %560 = vmax.xlane.f32.xlu0 %v559_v25 }
 0x39e   :  { %1051 = vrot.lane.b32.xlu0 %v2007_v50, %s1871_s6  ;;  %v512_v50 = vld [vmem:[%s2280_s7] sm:$0xf] }
 0x39f   :  { %v2139_v52 = vrot.slane %v512_v50, %v537_v46  ;;  %v2141_v55 = vrot.slane %v512_v50, %v522_v49  ;;  %v2143_v56 = vrot.slane %v512_v50, %v552_v51  ;;  %v2148_v6 = vrot.slane %v512_v50, %v567_v58 }
 0x3bd   :  { %518 = vmax.xlane.f32.xlu0 %v517_v2 }
 0x3c1   :  { %548 = vmax.xlane.f32.xlu0 %v547_v39 }
 0x3c5   :  { %563 = vmax.xlane.f32.xlu0 %v562_v40 }
 0x405   :  { %v592_v42 = vpop.xlane.xlu0 %591 }
 0x406   :  { %v593_v43 = vrot.slane %v592_v42, 4 }
 0x408   :  { %v594_v45 = vmax.f32 %v592_v42, %v593_v43 }
 0x409   :  { %v516_v47 = vpop.xlane.xlu0 %515 }
 0x40a   :  { %v595_v48 = vrot.slane %v594_v45, 2  ;;  %v524_v2 = vmul.f32 %v2141_v55, %v516_v47 }
 0x40c   :  { %v596_v53 = vmax.f32 %v594_v45, %v595_v48 }
 0x40d   :  { %v531_v54 = vpop.xlane.xlu0 %530 }
 0x40e   :  { %v597_v57 = vrot.slane %v596_v53, 1  ;;  %v539_v59 = vmul.f32 %v2139_v52, %v531_v54 }
 0x410   :  { %v598_v60 = vmax.f32 %v596_v53, %v597_v57  ;;  %v541_v11 = vadd.f32 %v539_v59, %v524_v2 }
 0x411   :  { %v546_v61 = vpop.xlane.xlu0 %545 }
 0x412   :  { %v554_v4 = vmul.f32 %v2143_v56, %v546_v61  ;;  %1788 = vpush %v598_v60 }
 0x414   :  { %v556_v14 = vadd.f32 %v554_v4, %v541_v11 }
 0x415   :  { %v561_v13 = vpop.xlane.xlu0 %560 }
 0x416   :  { %v569_v16 = vmul.f32 %v2148_v6, %v561_v13 }
 0x418   :  { %v571_v17 = vadd.f32 %v569_v16, %v556_v14 }
 0x419   :  { %v1052_v19 = vpop.permute.xlu0 %1051 }
 0x41a   :  { %v575_v23 = vsub.f32 %v573_v9, %v571_v17  ;;  %1648 = vmatprep.subr.mxu0 %v1052_v19 }
 0x41c   :  { %v577_v40 = vmul.f32 1.442695, %v575_v23 }
 0x443   :  { %s1789_s7 = spop %1788 }
 0x444   :  { %v600_v24 = vstv %s1789_s7 }
 0x445   :  { %v601_v25 = vsub.f32 %v585_v22, %v600_v24  ;;  %v602_v63 = vsub.f32 %v586_v21, %v600_v24 }
 0x447   :  { %v603_v39 = vmul.f32 1.442695, %v601_v25  ;;  %v605_v12 = vmul.f32 1.442695, %v602_v63 }
 0x449   :  { %1807 = vpow2.f32 %v603_v39 }
 0x44a   :  { %1809 = vpow2.f32 %v577_v40  ;;  %v519_v23 = vpop.xlane.xlu0 %518 }
 0x44b   :  { %1811 = vpow2.f32 %v605_v12  ;;  %v525_v40 = vmul.f32 %v2141_v55, %v519_v23 }
 0x44e   :  { %v549_v25 = vpop.xlane.xlu0 %548 }
 0x453   :  { %v1808_v41 = vpop.eup %1807 }
 0x454   :  { %v607_v42 = vadd.f32 0.0001, %v1808_v41  ;;  %v1810_v9 = vpop.eup %1809 }
 0x455   :  { %v581_v20 = vadd.f32 0.0001, %v1810_v9  ;;  %v1812_v10 = vpop.eup %1811 }
 0x456   :  { %v609_v43 = vmul.f32 0.25, %v607_v42  ;;  %v608_v18 = vadd.f32 0.0001, %v1812_v10  ;;  %v564_v42 = vpop.xlane.xlu0 %563 }
 0x457   :  { %v2161_v48 = vmul.f32 0.25, %v581_v20 }
 0x458   :  { %624 = vxpose.xlu1.b32.start.end [1/1] (short) (narrow) %v609_v43, 64  ;;  %v871_v44 = vsel %vm587_vm4, %v609_v43, 0.0  ;;  %v2166_v21 = vmul.f32 0.25, %v608_v18  ;;  %v555_v43 = vmul.f32 %v2143_v56, %v549_v25 }
 0x459   :  { %v872_v45 = vrot.slane %v871_v44, 4 }
 0x45b   :  { %v873_v7 = vadd.f32 %v872_v45, %v871_v44  ;;  %v570_v45 = vmul.f32 %v2148_v6, %v564_v42 }
 0x45d   :  { %v874_v46 = vrot.slane %v873_v7, 2 }
 0x45f   :  { %v875_v22 = vadd.f32 %v874_v46, %v873_v7 }
 0x461   :  { %v876_v47 = vrot.slane %v875_v22, 1 }
 0x463   :  { %v877_v49 = vadd.f32 %v876_v47, %v875_v22 }
 0x465   :  { %v878_v51 = vmul.f32 %v877_v49, %v2161_v48 }
 0x467   :  { %1638 = vmatmul.mubr.msk.f32.vlgmr.msra.gmra.mrb[4].mxu0 %vm587_vm4, %v878_v51 }
 0x468   :  { %1649 = vmatpush3.msra.mxu0 %v1052_v19 }
 0x469   :  { %1764 = vmatprep.subr.bf16.mxu0 %v1872_v28 }
 0x475   :  { %1018 = vxpose.xlu1.b32.start.end [1/1] (short) (narrow) %v2166_v21, 64 }
 0x4b8   :  { %533 = vmax.xlane.f32.xlu1 %v2031_v3 }
 0x4d8   :  { %v640_v50 = vpop.trf.xlu1 }
 0x4d9   :  { %1590 = vmatprep.mubr.msk.f32.mxu1 %vm660_vm7, %v640_v50 }
 0x4dc   :  { %v641_v53 = vpop.trf.xlu1 }
 0x4dd   :  { %1591 = vmatmul.mubr.msk.f32.vlgmr.msra.gmra.mrb[8].mxu1 %vm660_vm7, %v641_v53 }
 0x4e0   :  { %v642_v54 = vpop.trf.xlu1 }
 0x4e1   :  { %1593 = vmatprep.mubr.msk.f32.mxu1 %vm660_vm7, %v642_v54 }
 0x4e4   :  { %v643_v57 = vpop.trf.xlu1 }
 0x4e5   :  { %1594 = vmatmul.mubr.msk.f32.gmra.mrb[10].mxu1 %vm660_vm7, %v643_v57 }
 0x4e8   :  { %v644_v58 = vpop.trf.xlu1 }
 0x4e9   :  { %1596 = vmatprep.mubr.msk.f32.mxu1 %vm660_vm7, %v644_v58  ;;  %v1801_v58 = vld [vmem:[%s2282_s9] sm:$0xff]  }
 0x4ec   :  { %v645_v59 = vpop.trf.xlu1 }
 0x4ed   :  { %1597 = vmatmul.mubr.msk.f32.gmra.mrb[12].mxu1 %vm660_vm7, %v645_v59 }
 0x4f0   :  { %v646_v3 = vpop.trf.xlu1 }
 0x4f1   :  { %1599 = vmatprep.mubr.msk.f32.mxu1 %vm660_vm7, %v646_v3 }
 0x4f4   :  { %v647_v60 = vpop.trf.xlu1 }
 0x4f5   :  { %1600 = vmatmul.mubr.msk.f32.gmra.mrb[14].mxu1 %vm660_vm7, %v647_v60 }
 0x4f6   :  { %1618 = vmatprep.mubr.msk.f32.mxu1 %vm1869_vm1, %v1868_v15 }
 0x4f8   :  { %v1034_v61 = vpop.trf.xlu1 }
 0x4f9   :  { %1650 = vmatprep.mubr.msk.f32.mxu0 %vm660_vm7, %v1034_v61 }
 0x4fc   :  { %v1035_v2 = vpop.trf.xlu1 }
 0x4fd   :  { %1651 = vmatmul.mubr.msk.f32.vlgmr.msra.gmra.mrb[6].mxu0 %vm660_vm7, %v1035_v2 }
 0x500   :  { %v1036_v4 = vpop.trf.xlu1 }
 0x501   :  { %1653 = vmatprep.mubr.msk.f32.mxu0 %vm660_vm7, %v1036_v4 }
 0x504   :  { %v1037_v11 = vpop.trf.xlu1 }
 0x505   :  { %1654 = vmatmul.mubr.msk.f32.gmra.mrb[8].mxu0 %vm660_vm7, %v1037_v11 }
 0x508   :  { %v1038_v13 = vpop.trf.xlu1 }
 0x509   :  { %1656 = vmatprep.mubr.msk.f32.mxu0 %vm660_vm7, %v1038_v13 }
 0x50c   :  { %v1039_v14 = vpop.trf.xlu1 }
 0x50d   :  { %1657 = vmatmul.mubr.msk.f32.gmra.mrb[10].mxu0 %vm660_vm7, %v1039_v14 }
 0x510   :  { %v1040_v16 = vpop.trf.xlu1 }
 0x511   :  { %1659 = vmatprep.mubr.msk.f32.mxu0 %vm660_vm7, %v1040_v16 }
 0x514   :  { %v1041_v17 = vpop.trf.xlu1 }
 0x515   :  { %1660 = vmatmul.mubr.msk.f32.gmra.mrb[12].mxu0 %vm660_vm7, %v1041_v17 }
 0x516   :  { %1678 = vmatprep.mubr.msk.f32.mxu0 %vm1869_vm1, %v1868_v15 }
 0x53a   :  { %v2190_v19 = vpop.f32.mrb[4].mxu0 }
 0x53b   :  { %v1639_v24 = vpop.f32.mrb[5].mxu0 }
 0x545   :  { %v534_v39 = vpop.xlane.xlu1 %533 }
 0x546   :  { %v540_v41 = vmul.f32 %v2139_v52, %v534_v39 }
 0x548   :  { %v542_v44 = vadd.f32 %v540_v41, %v525_v40 }
 0x54a   :  { %v557_v63 = vadd.f32 %v555_v43, %v542_v44 }
 0x54c   :  { %v572_v7 = vadd.f32 %v570_v45, %v557_v63 }
 0x54e   :  { %v576_v9 = vsub.f32 %v574_v8, %v572_v7 }
 0x5b0   :  { %v1592_v46 = vpop.f32.mrb[8].mxu1 }
 0x5b1   :  { %v791_v12 = vmul.f32 %v1592_v46, %v2073_v27  ;;  %v751_v20 = vpop.f32.mrb[9].mxu1 }
 0x5b2   :  { %v790_v55 = vmul.f32 %v751_v20, %v2068_v26 }
 0x5b4   :  { %v1741_v22 = vpack.c.bf16 %v791_v12, %v790_v55  ;;  %v1434_v55 = vld [vmem:[%s2283_s10] ss:$0 sm:$0xff]  ;;  %s1841_s10 = scalar_lea.vmem %s1399_s13, 256 }
 0x5b5   :  { %p1842_p8 = scmp.ne.s32.totalorder %s1399_s13, %s1841_s10  ;;  %p1847_p10 = scmp.lt.s32.totalorder %s1841_s10, %s1841_s10 }
 0x5b6   :  { %1742 = vmatpush3.bf16.msra.mxu1 %v1741_v22 }
 0x5b7   :  { %1743 = vmatprep.subr.bf16.mxu1 %v1872_v28  ;;  %p1848_p11 = por %p1847_p10, %p1846_p9 }
 0x5b8   :  { %v1595_v52 = vpop.f32.mrb[10].mxu1 }
 0x5b9   :  { %v793_v56 = vmul.f32 %v1595_v52, %v2091_v31  ;;  %v761_v6 = vpop.f32.mrb[11].mxu1  ;;  %p1849_p12 = pnand %p1848_p11, %p1842_p8 }
 0x5ba   :  { %v792_v47 = vmul.f32 %v761_v6, %v2086_v30 }
 0x5bc   :  { %v1744_v49 = vpack.c.bf16 %v793_v56, %v792_v47 }
 0x5be   :  { %1745 = vmatpush3.bf16.msra.mxu1 %v1744_v49 }
 0x5bf   :  { %1746 = vmatprep.subr.bf16.mxu1 %v1872_v28 }
 0x5c0   :  { %v1598_v62 = vpop.f32.mrb[12].mxu1 }
 0x5c1   :  { %v795_v5 = vmul.f32 %v1598_v62, %v2107_v34  ;;  %v771_v8 = vpop.f32.mrb[13].mxu1 }
 0x5c2   :  { %v794_v51 = vmul.f32 %v771_v8, %v2102_v33 }
 0x5c4   :  { %v1747_v10 = vpack.c.bf16 %v795_v5, %v794_v51 }
 0x5c6   :  { %1748 = vmatpush3.bf16.msra.mxu1 %v1747_v10 }
 0x5c7   :  { %1749 = vmatprep.subr.bf16.mxu1 %v1872_v28 }
 0x5c8   :  { %v1601_v18 = vpop.f32.mrb[14].mxu1 }
 0x5c9   :  { %v797_v50 = vmul.f32 %v1601_v18, %v2123_v37  ;;  %v781_v53 = vpop.f32.mrb[15].mxu1 }
 0x5ca   :  { %v796_v54 = vmul.f32 %v781_v53, %v2118_v36 }
 0x5cc   :  { %v1750_v57 = vpack.c.bf16 %v797_v50, %v796_v54 }
 0x5ce   :  { %1751 = vmatpush3.bf16.msra.mxu1 %v1750_v57 }
 0x5cf   :  { %1640 = vmatprep.subr.bf16.mxu1 %v1868_v15 }
 0x5d0   :  { %v1652_v59 = vpop.f32.mrb[6].mxu0 }
 0x5d1   :  { %1619 = vmatmul.mubr.msk.f32.vlgmr.msra.gmra.mrb[16].mxu1 %vm587_vm4, %v2161_v48  ;;  %v1184_v3 = vmul.f32 %v1652_v59, %v2073_v27  ;;  %v1144_v60 = vpop.f32.mrb[7].mxu0  ;;  %v579_v48 = vmul.f32 1.442695, %v576_v9 }
 0x5d2   :  { %v1183_v61 = vmul.f32 %v1144_v60, %v2068_v26  ;;  %1641 = vmatpush3.bf16.msra.mxu1 %v1801_v58  ;;  %1644 = vmatprep.mubr.msk.bf16.mxu1 %vm1869_vm1, %v1868_v15 }
 0x5d3   :  { %1642 = vmatprep.subr.bf16.mxu1 %v1868_v15  ;;  %1813 = vpow2.f32 %v579_v48 }
 0x5d4   :  { %v1765_v2 = vpack.c.bf16 %v1184_v3, %v1183_v61  ;;  %1815 = vrcp.f32 %v2190_v19 }
 0x5d6   :  { %1766 = vmatpush3.bf16.msra.mxu0 %v1765_v2 }
 0x5d7   :  { %1767 = vmatprep.subr.bf16.mxu0 %v1872_v28 }
 0x5d8   :  { %v1655_v4 = vpop.f32.mrb[8].mxu0 }
 0x5d9   :  { %v1186_v11 = vmul.f32 %v1655_v4, %v2091_v31  ;;  %v1154_v13 = vpop.f32.mrb[9].mxu0 }
 0x5da   :  { %v1185_v27 = vmul.f32 %v1154_v13, %v2086_v30 }
 0x5dc   :  { %v1768_v14 = vpack.c.bf16 %v1186_v11, %v1185_v27 }
 0x5dd   :  { %v1814_v31 = vpop.eup %1813 }
 0x5de   :  { %1769 = vmatpush3.bf16.msra.mxu0 %v1768_v14  ;;  %v582_v41 = vadd.f32 0.0001, %v1814_v31 }
 0x5df   :  { %1770 = vmatprep.subr.bf16.mxu0 %v1872_v28 }
 0x5e0   :  { %v1658_v26 = vpop.f32.mrb[10].mxu0  ;;  %v584_v43 = vmul.f32 0.25, %v582_v41 }
 0x5e1   :  { %v1188_v16 = vmul.f32 %v1658_v26, %v2107_v34  ;;  %v1164_v17 = vpop.f32.mrb[11].mxu0  ;;  %v1264_v34 = vsel %vm587_vm4, %v2166_v21, 0.0 }
 0x5e2   :  { %v1187_v23 = vmul.f32 %v1164_v17, %v2102_v33  ;;  %v1802_v33 = vld [vmem:[%s2282_s9 + $0x8] sm:$0xff]  }
 0x5e3   :  { %1643 = vmatpush3.bf16.msra.mxu1 %v1802_v33 }
 0x5e4   :  { %v1771_v24 = vpack.c.bf16 %v1188_v16, %v1187_v23  ;;  %1776 = vmatprep.subr.bf16.mxu1 %v1872_v28 }
 0x5e6   :  { %1772 = vmatpush3.bf16.msra.mxu0 %v1771_v24 }
 0x5e7   :  { %1773 = vmatprep.subr.bf16.mxu0 %v1872_v28 }
 0x5e8   :  { %v1661_v25 = vpop.f32.mrb[12].mxu0 }
 0x5e9   :  { %v1190_v39 = vmul.f32 %v1661_v25, %v2123_v37  ;;  %v1174_v30 = vpop.f32.mrb[13].mxu0  ;;  %v1816_v37 = vpop.eup %1815 }
 0x5ea   :  { %v1189_v40 = vmul.f32 %v1174_v30, %v2118_v36  ;;  %v1265_v36 = vrot.slane %v1264_v34, 4 }
 0x5ec   :  { %v1774_v42 = vpack.c.bf16 %v1190_v39, %v1189_v40  ;;  %v1266_v45 = vadd.f32 %v1265_v36, %v1264_v34 }
 0x5ee   :  { %1775 = vmatpush3.bf16.msra.mxu0 %v1774_v42  ;;  %v1267_v46 = vrot.slane %v1266_v45, 2 }
 0x5ef   :  { %1700 = vmatprep.subr.bf16.mxu0 %v1868_v15 }
 0x5f0   :  { %v1268_v19 = vadd.f32 %v1267_v46, %v1266_v45 }
 0x5f1   :  { %1679 = vmatmul.mubr.msk.f32.vlgmr.msra.gmra.mrb[14].mxu0 %vm587_vm4, %v584_v43 }
 0x5f2   :  { %1701 = vmatpush3.bf16.msra.mxu0 %v1801_v58  ;;  %1704 = vmatprep.mubr.msk.bf16.mxu0 %vm1869_vm1, %v1868_v15  ;;  %v1269_v21 = vrot.slane %v1268_v19, 1 }
 0x5f3   :  { %1702 = vmatprep.subr.bf16.mxu0 %v1868_v15 }
 0x5f4   :  { %v1270_v12 = vadd.f32 %v1269_v21, %v1268_v19 }
 0x5f6   :  { %1703 = vmatpush3.bf16.msra.mxu0 %v1802_v33  ;;  %v1271_v20 = vmul.f32 %v1270_v12, %v584_v43 }
 0x6a4   :  { %v867_v44 = vpop.f32.mrb[16].mxu1 }
 0x6a5   :  { %v953_v63 = vmul.f32 %v1816_v37, %v867_v44  ;;  %v1620_v7 = vpop.f32.mrb[17].mxu1 }
 0x6a7   :  { %v954_v9 = vpack.c.bf16 %v953_v63, %v953_v63 }
 0x6a9   :  { %1645 = vmatmul.mubr.msk.bf16.vlgmr.msra.gmra.mrb[20].mxu1 %vm56_vm0, %v954_v9 }
 0x6aa   :  { %1778 = vmatpush3.bf16.msra.mxu1 %v2078_v29  ;;  %1697 = vmatprep.mubr.msk.f32.mxu1 %vm1869_vm1, %v1868_v15 }
 0x6ab   :  { %1779 = vmatprep.subr.bf16.mxu1 %v1872_v28 }
 0x6ae   :  { %1781 = vmatpush3.bf16.msra.mxu1 %v2095_v32 }
 0x6af   :  { %1782 = vmatprep.subr.bf16.mxu1 %v1872_v28 }
 0x6b2   :  { %1784 = vmatpush3.bf16.msra.mxu1 %v2111_v35 }
 0x6b3   :  { %1785 = vmatprep.subr.bf16.mxu1 %v1872_v28 }
 0x6b6   :  { %1787 = vmatpush3.bf16.msra.mxu1 %v2127_v38 }
 0x6b9   :  { %1698 = vmatmul.mubr.msk.f32.vlgmr.msra.gmra.mrb[18].mxu1 %vm587_vm4, %v1271_v20 }
 0x6c4   :  { %v1260_v29 = vpop.f32.mrb[14].mxu0 }
 0x6c5   :  { %v1680_v15 = vpop.f32.mrb[15].mxu0 }
 0x77c   :  { %v1010_v32 = vpop.f32.mrb[20].mxu1 }
 0x77d   :  { %v1011_v22 = vadd.f32 %v1434_v55, %v1010_v32  ;;  %v1646_v52 = vpop.f32.mrb[21].mxu1 }
 0x77e   :  { %v1013_v56 = vpop.f32.mrb[22].mxu1 }
 0x77f   :  { %v1016_v35 = vadd.f32 %v1011_v22, %v1951_v0  ;;  %v1647_v6 = vpop.f32.mrb[23].mxu1 }
 0x781   :  { %1017 = vst.msk [vmem:[#allocation5] sm:$0xff] %vm56_vm0, %v1016_v35 }
 0x78c   :  { %v1341_v28 = vpop.f32.mrb[18].mxu1 }
 0x78d   :  { %1817 = vrcp.f32 %v1341_v28  ;;  %v1699_v38 = vpop.f32.mrb[19].mxu1 }
 0x797   :  { %v1818_v47 = vpop.eup %1817 }
 0x798   :  { %v1346_v49 = vmul.f32 %v1818_v47, %v1260_v29 }
 0x79a   :  { %v1347_v62 = vpack.c.bf16 %v1346_v49, %v1346_v49 }
 0x79c   :  { %1705 = vmatmul.mubr.msk.bf16.vlgmr.msra.gmra.mrb[16].mxu0 %vm56_vm0, %v1347_v62 }
 0x86f   :  { %v1385_v5 = vpop.f32.mrb[16].mxu0 }
 0x870   :  { %v1386_v8 = vadd.f32 %v1434_v55, %v1385_v5  ;;  %v1706_v51 = vpop.f32.mrb[17].mxu0 }
 0x871   :  { %v1388_v10 = vpop.f32.mrb[18].mxu0 }
 0x872   :  { %v1391_v0 = vadd.f32 %v1386_v8, %v1956_v1  ;;  %v1707_v18 = vpop.f32.mrb[19].mxu0 }
 0x874   :  { %1392 = vst.msk [vmem:[#allocation5 + $0x8] sm:$0xff] %vm56_vm0, %v1391_v0 }
 0x875   :  { %1852 = shalt.err (!%p1849_p12)
}
 0x876   :  { %s1853_s0 = scalar_lea.hbm %s2284_s11, 256 }
 0x877   :  { %p1854_p13 = scmp.ne.s32.totalorder %s2284_s11, %s1853_s0  ;;  %p1857_p0 = scmp.lt.u32.totalorder %s1853_s0, %s2284_s11 }
 0x879   :  { %p1859_p1 = pnand %p1857_p0, %p1854_p13 }
 0x87b   :  { %1862 = shalt.err (!%p1859_p1)
}
 0x87c   :  { %s1874_s18 = smov 128   ;;  %s1875_s19 = smov 8  }
 0x87d   :  { %1404 = dma.vmem_to_hbm [thread:$0]  %s1399_s13, 256, %s2284_s11, [#allocation4], %s1874_s18, %s1874_s18, %s1875_s19  }
 0x87e   :  { %1865 = dma.done.wait [#allocation4], 256  }
 0x87f   :  { %1866 = vsyncadd [#allocation4], 4294967040 }
 0x880   :  { %1408 = vsyncpa [#allocation3], 1 }
 0x881   :  { %1409 = vsyncpa [#allocation4], 1 }

</bundles_post_ra>
